<compile_context>
chip_gen: v6e
topology: v6e:2x2x1
jax: 0.10.0
libtpu: 0.0.40
codegen_flags: <defaults>
</compile_context>

<pallas_src>
import jax
import jax.numpy as jnp
from jax.experimental import pallas as pl
from jax.experimental.pallas import tpu as pltpu

_LANE = 128


def hl_kernel(tab_ref, dtab_ref, x_ref, o_ref):
    """1-D multilinear interpolation of the precomputed lattice table.

    tab_ref  : SMEM [L]       lattice vertex values out[k]
    dtab_ref : SMEM [L]       first difference out[k+1] - out[k] (last entry unused)
    x_ref    : VMEM [TR, 128] batch tile, batch on the lane axis
    o_ref    : VMEM [TR, 128] interpolated predictions, same layout
    """
    L = tab_ref.shape[0]
    x = x_ref[...]                                   # [TR, 128]
    c = x * jnp.float32(L - 1)                       # coordinates * (mesh_size - 1)
    ci = jnp.clip(c.astype(jnp.int32), 0, L - 2)     # .to(torch.long) + _clamp
    cf = c - ci.astype(jnp.float32)                  # fractional part (post-clamp)

    # Gather table[ci] and table[ci+1]-table[ci] via a short static select chain
    # driven by cheap SMEM scalar reads: pure VPU, full lane utilization.
    base = jnp.zeros_like(x)
    slope = jnp.zeros_like(x)
    for k in range(L - 1):                           # static, small L
        m = ci == k
        base = jnp.where(m, tab_ref[k], base)
        slope = jnp.where(m, dtab_ref[k], slope)

    # pred = table[ci] * (1 - cf) + table[ci + 1] * cf
    o_ref[...] = base + cf * slope


def hl_forward(x, b, *, max_block_rows=64):
    """x: [B, 1] float32 in [0, 1];  b: [L] float32 lattice logits.  Returns [B, 1]."""
    B = x.shape[0]
    L = b.shape[0]

    # --- batch-independent prologue (plain JAX, computed once, not per tile) ---
    # Right-skewed chain recurrence has the closed form 1 - cumprod(1 - sigmoid(b)).
    s = jax.nn.sigmoid(b.astype(jnp.float32))                    # [L]
    table = 1.0 - jnp.cumprod(1.0 - s)                           # [L]
    dtable = jnp.concatenate(
        [table[1:] - table[:-1], jnp.zeros((1,), jnp.float32)])  # [L], last unused

    # --- batch-on-lane layout: pad B up to full (TR, 128) tiles ---
    xf = x.reshape(-1).astype(jnp.float32)                       # [B]
    rows = max(1, -(-B // _LANE))                                # ceil(B / 128)
    block_rows = min(max_block_rows, -(-rows // 8) * 8)          # multiple of 8
    R = -(-rows // block_rows) * block_rows                      # rows, padded
    B_pad = R * _LANE
    xp = jnp.pad(xf, (0, B_pad - B)).reshape(R, _LANE)           # [R, 128]

    grid = (R // block_rows,)

    out2 = pl.pallas_call(
        hl_kernel,
        out_shape=jax.ShapeDtypeStruct((R, _LANE), jnp.float32),
        grid=grid,
        in_specs=[
            pl.BlockSpec(memory_space=pltpu.MemorySpace.SMEM),   # table  [L]
            pl.BlockSpec(memory_space=pltpu.MemorySpace.SMEM),   # dtable [L]
            pl.BlockSpec((block_rows, _LANE), lambda i: (i, 0)),
        ],
        out_specs=pl.BlockSpec((block_rows, _LANE), lambda i: (i, 0)),
        compiler_params=pltpu.CompilerParams(
            dimension_semantics=("parallel",)),                  # 2 TCs on v7x
    )(table, dtable, xp)

    return out2.reshape(-1)[:B].reshape(B, 1)


def hl_reference(x, b):
    """Plain-JAX reference mirroring the same semantics (for a sanity check)."""
    L = b.shape[0]
    s = jax.nn.sigmoid(b)
    out = [s[0]]
    for k in range(1, L):
        out.append(out[-1] + s[k] * (1.0 - out[-1]))              # torch.lerp(lb, 1, s)
    out = jnp.stack(out)                                          # [L]
    c = x[:, 0] * (L - 1)
    ci = jnp.clip(c.astype(jnp.int32), 0, L - 2)
    cf = c - ci.astype(jnp.float32)
    pred = out[ci] * (1.0 - cf) + out[ci + 1] * cf
    return pred[:, None]


if __name__ == "__main__":
    key = jax.random.PRNGKey(0)
    kx, kb = jax.random.split(key)

    B, L = 8, 16   # batch=8, lattice_sizes = tensor([16]), indices_increasing = [0]

    # inputs must lie in [0, 1] (lattice coordinates)
    x = jax.random.uniform(kx, (B, 1), dtype=jnp.float32)
    # parameter init: b ~ Normal(0, sqrt(2 / output_len)) per element (deterministic)
    b = jax.random.normal(kb, (L,), dtype=jnp.float32) * jnp.sqrt(2.0 / L)

    y = hl_forward(x, b)
    jax.block_until_ready(y)

    y_ref = hl_reference(x, b)
    assert y.shape == (B, 1)
    assert jnp.allclose(y, y_ref, atol=1e-5, rtol=1e-5)

    print("KERNEL_OK")
</pallas_src>

<mosaic_0001>
module attributes {stable_mosaic.version = 11 : i64} {
  func.func @hl_kernel(%arg0: i32, %arg1: memref<16xf32, #tpu.memory_space<smem>>, %arg2: memref<16xf32, #tpu.memory_space<smem>>, %arg3: memref<8x128xf32, #tpu.memory_space<vmem>>, %arg4: memref<8x128xf32, #tpu.memory_space<vmem>>) attributes {dimension_semantics = [#tpu.dimension_semantics<parallel>], iteration_bounds = array<i64: 1>, scalar_prefetch = 0 : i64, scratch_operands = 0 : i64, tpu.core_type = #tpu.core_type<tc>, window_params = [{transform_indices = @transform_0, window_bounds = array<i64: 16>}, {transform_indices = @transform_1, window_bounds = array<i64: 16>}, {transform_indices = @transform_2, window_bounds = array<i64: 8, 128>}, {transform_indices = @transform_3, window_bounds = array<i64: 8, 128>}]} {
    %c0 = arith.constant 0 : index
    %c0_0 = arith.constant 0 : index
    %0 = vector.load %arg3[%c0, %c0_0] : memref<8x128xf32, #tpu.memory_space<vmem>>, vector<8x128xf32>
    %cst = arith.constant 1.500000e+01 : f32
    %1 = vector.broadcast %cst : f32 to vector<8x128xf32>
    %2 = arith.mulf %0, %1 : vector<8x128xf32>
    %3 = arith.fptosi %2 : vector<8x128xf32> to vector<8x128xi32>
    %c0_i32 = arith.constant 0 : i32
    %c14_i32 = arith.constant 14 : i32
    %4 = vector.broadcast %c0_i32 : i32 to vector<8x128xi32>
    %5 = arith.maxsi %4, %3 : vector<8x128xi32>
    %6 = vector.broadcast %c14_i32 : i32 to vector<8x128xi32>
    %7 = arith.minsi %6, %5 : vector<8x128xi32>
    %8 = arith.sitofp %7 : vector<8x128xi32> to vector<8x128xf32>
    %9 = arith.subf %2, %8 : vector<8x128xf32>
    %cst_1 = arith.constant 0.000000e+00 : f32
    %10 = vector.broadcast %cst_1 : f32 to vector<8x128xf32>
    %cst_2 = arith.constant 0.000000e+00 : f32
    %11 = vector.broadcast %cst_2 : f32 to vector<8x128xf32>
    %c0_i32_3 = arith.constant 0 : i32
    %12 = vector.broadcast %c0_i32_3 : i32 to vector<8x128xi32>
    %13 = arith.cmpi eq, %7, %12 : vector<8x128xi32>
    %c0_4 = arith.constant 0 : index
    %14 = memref.load %arg1[%c0_4] : memref<16xf32, #tpu.memory_space<smem>>
    %15 = vector.broadcast %14 : f32 to vector<8x128xf32>
    %16 = arith.select %13, %15, %10 : vector<8x128xi1>, vector<8x128xf32>
    %c0_5 = arith.constant 0 : index
    %17 = memref.load %arg2[%c0_5] : memref<16xf32, #tpu.memory_space<smem>>
    %18 = vector.broadcast %17 : f32 to vector<8x128xf32>
    %19 = arith.select %13, %18, %11 : vector<8x128xi1>, vector<8x128xf32>
    %c1_i32 = arith.constant 1 : i32
    %20 = vector.broadcast %c1_i32 : i32 to vector<8x128xi32>
    %21 = arith.cmpi eq, %7, %20 : vector<8x128xi32>
    %c1 = arith.constant 1 : index
    %22 = memref.load %arg1[%c1] : memref<16xf32, #tpu.memory_space<smem>>
    %23 = vector.broadcast %22 : f32 to vector<8x128xf32>
    %24 = arith.select %21, %23, %16 : vector<8x128xi1>, vector<8x128xf32>
    %c1_6 = arith.constant 1 : index
    %25 = memref.load %arg2[%c1_6] : memref<16xf32, #tpu.memory_space<smem>>
    %26 = vector.broadcast %25 : f32 to vector<8x128xf32>
    %27 = arith.select %21, %26, %19 : vector<8x128xi1>, vector<8x128xf32>
    %c2_i32 = arith.constant 2 : i32
    %28 = vector.broadcast %c2_i32 : i32 to vector<8x128xi32>
    %29 = arith.cmpi eq, %7, %28 : vector<8x128xi32>
    %c2 = arith.constant 2 : index
    %30 = memref.load %arg1[%c2] : memref<16xf32, #tpu.memory_space<smem>>
    %31 = vector.broadcast %30 : f32 to vector<8x128xf32>
    %32 = arith.select %29, %31, %24 : vector<8x128xi1>, vector<8x128xf32>
    %c2_7 = arith.constant 2 : index
    %33 = memref.load %arg2[%c2_7] : memref<16xf32, #tpu.memory_space<smem>>
    %34 = vector.broadcast %33 : f32 to vector<8x128xf32>
    %35 = arith.select %29, %34, %27 : vector<8x128xi1>, vector<8x128xf32>
    %c3_i32 = arith.constant 3 : i32
    %36 = vector.broadcast %c3_i32 : i32 to vector<8x128xi32>
    %37 = arith.cmpi eq, %7, %36 : vector<8x128xi32>
    %c3 = arith.constant 3 : index
    %38 = memref.load %arg1[%c3] : memref<16xf32, #tpu.memory_space<smem>>
    %39 = vector.broadcast %38 : f32 to vector<8x128xf32>
    %40 = arith.select %37, %39, %32 : vector<8x128xi1>, vector<8x128xf32>
    %c3_8 = arith.constant 3 : index
    %41 = memref.load %arg2[%c3_8] : memref<16xf32, #tpu.memory_space<smem>>
    %42 = vector.broadcast %41 : f32 to vector<8x128xf32>
    %43 = arith.select %37, %42, %35 : vector<8x128xi1>, vector<8x128xf32>
    %c4_i32 = arith.constant 4 : i32
    %44 = vector.broadcast %c4_i32 : i32 to vector<8x128xi32>
    %45 = arith.cmpi eq, %7, %44 : vector<8x128xi32>
    %c4 = arith.constant 4 : index
    %46 = memref.load %arg1[%c4] : memref<16xf32, #tpu.memory_space<smem>>
    %47 = vector.broadcast %46 : f32 to vector<8x128xf32>
    %48 = arith.select %45, %47, %40 : vector<8x128xi1>, vector<8x128xf32>
    %c4_9 = arith.constant 4 : index
    %49 = memref.load %arg2[%c4_9] : memref<16xf32, #tpu.memory_space<smem>>
    %50 = vector.broadcast %49 : f32 to vector<8x128xf32>
    %51 = arith.select %45, %50, %43 : vector<8x128xi1>, vector<8x128xf32>
    %c5_i32 = arith.constant 5 : i32
    %52 = vector.broadcast %c5_i32 : i32 to vector<8x128xi32>
    %53 = arith.cmpi eq, %7, %52 : vector<8x128xi32>
    %c5 = arith.constant 5 : index
    %54 = memref.load %arg1[%c5] : memref<16xf32, #tpu.memory_space<smem>>
    %55 = vector.broadcast %54 : f32 to vector<8x128xf32>
    %56 = arith.select %53, %55, %48 : vector<8x128xi1>, vector<8x128xf32>
    %c5_10 = arith.constant 5 : index
    %57 = memref.load %arg2[%c5_10] : memref<16xf32, #tpu.memory_space<smem>>
    %58 = vector.broadcast %57 : f32 to vector<8x128xf32>
    %59 = arith.select %53, %58, %51 : vector<8x128xi1>, vector<8x128xf32>
    %c6_i32 = arith.constant 6 : i32
    %60 = vector.broadcast %c6_i32 : i32 to vector<8x128xi32>
    %61 = arith.cmpi eq, %7, %60 : vector<8x128xi32>
    %c6 = arith.constant 6 : index
    %62 = memref.load %arg1[%c6] : memref<16xf32, #tpu.memory_space<smem>>
    %63 = vector.broadcast %62 : f32 to vector<8x128xf32>
    %64 = arith.select %61, %63, %56 : vector<8x128xi1>, vector<8x128xf32>
    %c6_11 = arith.constant 6 : index
    %65 = memref.load %arg2[%c6_11] : memref<16xf32, #tpu.memory_space<smem>>
    %66 = vector.broadcast %65 : f32 to vector<8x128xf32>
    %67 = arith.select %61, %66, %59 : vector<8x128xi1>, vector<8x128xf32>
    %c7_i32 = arith.constant 7 : i32
    %68 = vector.broadcast %c7_i32 : i32 to vector<8x128xi32>
    %69 = arith.cmpi eq, %7, %68 : vector<8x128xi32>
    %c7 = arith.constant 7 : index
    %70 = memref.load %arg1[%c7] : memref<16xf32, #tpu.memory_space<smem>>
    %71 = vector.broadcast %70 : f32 to vector<8x128xf32>
    %72 = arith.select %69, %71, %64 : vector<8x128xi1>, vector<8x128xf32>
    %c7_12 = arith.constant 7 : index
    %73 = memref.load %arg2[%c7_12] : memref<16xf32, #tpu.memory_space<smem>>
    %74 = vector.broadcast %73 : f32 to vector<8x128xf32>
    %75 = arith.select %69, %74, %67 : vector<8x128xi1>, vector<8x128xf32>
    %c8_i32 = arith.constant 8 : i32
    %76 = vector.broadcast %c8_i32 : i32 to vector<8x128xi32>
    %77 = arith.cmpi eq, %7, %76 : vector<8x128xi32>
    %c8 = arith.constant 8 : index
    %78 = memref.load %arg1[%c8] : memref<16xf32, #tpu.memory_space<smem>>
    %79 = vector.broadcast %78 : f32 to vector<8x128xf32>
    %80 = arith.select %77, %79, %72 : vector<8x128xi1>, vector<8x128xf32>
    %c8_13 = arith.constant 8 : index
    %81 = memref.load %arg2[%c8_13] : memref<16xf32, #tpu.memory_space<smem>>
    %82 = vector.broadcast %81 : f32 to vector<8x128xf32>
    %83 = arith.select %77, %82, %75 : vector<8x128xi1>, vector<8x128xf32>
    %c9_i32 = arith.constant 9 : i32
    %84 = vector.broadcast %c9_i32 : i32 to vector<8x128xi32>
    %85 = arith.cmpi eq, %7, %84 : vector<8x128xi32>
    %c9 = arith.constant 9 : index
    %86 = memref.load %arg1[%c9] : memref<16xf32, #tpu.memory_space<smem>>
    %87 = vector.broadcast %86 : f32 to vector<8x128xf32>
    %88 = arith.select %85, %87, %80 : vector<8x128xi1>, vector<8x128xf32>
    %c9_14 = arith.constant 9 : index
    %89 = memref.load %arg2[%c9_14] : memref<16xf32, #tpu.memory_space<smem>>
    %90 = vector.broadcast %89 : f32 to vector<8x128xf32>
    %91 = arith.select %85, %90, %83 : vector<8x128xi1>, vector<8x128xf32>
    %c10_i32 = arith.constant 10 : i32
    %92 = vector.broadcast %c10_i32 : i32 to vector<8x128xi32>
    %93 = arith.cmpi eq, %7, %92 : vector<8x128xi32>
    %c10 = arith.constant 10 : index
    %94 = memref.load %arg1[%c10] : memref<16xf32, #tpu.memory_space<smem>>
    %95 = vector.broadcast %94 : f32 to vector<8x128xf32>
    %96 = arith.select %93, %95, %88 : vector<8x128xi1>, vector<8x128xf32>
    %c10_15 = arith.constant 10 : index
    %97 = memref.load %arg2[%c10_15] : memref<16xf32, #tpu.memory_space<smem>>
    %98 = vector.broadcast %97 : f32 to vector<8x128xf32>
    %99 = arith.select %93, %98, %91 : vector<8x128xi1>, vector<8x128xf32>
    %c11_i32 = arith.constant 11 : i32
    %100 = vector.broadcast %c11_i32 : i32 to vector<8x128xi32>
    %101 = arith.cmpi eq, %7, %100 : vector<8x128xi32>
    %c11 = arith.constant 11 : index
    %102 = memref.load %arg1[%c11] : memref<16xf32, #tpu.memory_space<smem>>
    %103 = vector.broadcast %102 : f32 to vector<8x128xf32>
    %104 = arith.select %101, %103, %96 : vector<8x128xi1>, vector<8x128xf32>
    %c11_16 = arith.constant 11 : index
    %105 = memref.load %arg2[%c11_16] : memref<16xf32, #tpu.memory_space<smem>>
    %106 = vector.broadcast %105 : f32 to vector<8x128xf32>
    %107 = arith.select %101, %106, %99 : vector<8x128xi1>, vector<8x128xf32>
    %c12_i32 = arith.constant 12 : i32
    %108 = vector.broadcast %c12_i32 : i32 to vector<8x128xi32>
    %109 = arith.cmpi eq, %7, %108 : vector<8x128xi32>
    %c12 = arith.constant 12 : index
    %110 = memref.load %arg1[%c12] : memref<16xf32, #tpu.memory_space<smem>>
    %111 = vector.broadcast %110 : f32 to vector<8x128xf32>
    %112 = arith.select %109, %111, %104 : vector<8x128xi1>, vector<8x128xf32>
    %c12_17 = arith.constant 12 : index
    %113 = memref.load %arg2[%c12_17] : memref<16xf32, #tpu.memory_space<smem>>
    %114 = vector.broadcast %113 : f32 to vector<8x128xf32>
    %115 = arith.select %109, %114, %107 : vector<8x128xi1>, vector<8x128xf32>
    %c13_i32 = arith.constant 13 : i32
    %116 = vector.broadcast %c13_i32 : i32 to vector<8x128xi32>
    %117 = arith.cmpi eq, %7, %116 : vector<8x128xi32>
    %c13 = arith.constant 13 : index
    %118 = memref.load %arg1[%c13] : memref<16xf32, #tpu.memory_space<smem>>
    %119 = vector.broadcast %118 : f32 to vector<8x128xf32>
    %120 = arith.select %117, %119, %112 : vector<8x128xi1>, vector<8x128xf32>
    %c13_18 = arith.constant 13 : index
    %121 = memref.load %arg2[%c13_18] : memref<16xf32, #tpu.memory_space<smem>>
    %122 = vector.broadcast %121 : f32 to vector<8x128xf32>
    %123 = arith.select %117, %122, %115 : vector<8x128xi1>, vector<8x128xf32>
    %c14_i32_19 = arith.constant 14 : i32
    %124 = vector.broadcast %c14_i32_19 : i32 to vector<8x128xi32>
    %125 = arith.cmpi eq, %7, %124 : vector<8x128xi32>
    %c14 = arith.constant 14 : index
    %126 = memref.load %arg1[%c14] : memref<16xf32, #tpu.memory_space<smem>>
    %127 = vector.broadcast %126 : f32 to vector<8x128xf32>
    %128 = arith.select %125, %127, %120 : vector<8x128xi1>, vector<8x128xf32>
    %c14_20 = arith.constant 14 : index
    %129 = memref.load %arg2[%c14_20] : memref<16xf32, #tpu.memory_space<smem>>
    %130 = vector.broadcast %129 : f32 to vector<8x128xf32>
    %131 = arith.select %125, %130, %123 : vector<8x128xi1>, vector<8x128xf32>
    %132 = arith.mulf %9, %131 : vector<8x128xf32>
    %133 = arith.addf %128, %132 : vector<8x128xf32>
    %c0_21 = arith.constant 0 : index
    %c0_22 = arith.constant 0 : index
    %134 = vector.load %arg4[%c0_21, %c0_22] : memref<8x128xf32, #tpu.memory_space<vmem>>, vector<8x128xf32>
    tpu.vector_store %arg4[%c0_21, %c0_22], %133 {strides = array<i32>} : memref<8x128xf32, #tpu.memory_space<vmem>>, vector<8x128xf32>,
    return
  }
  func.func @transform_0(%arg0: i32) -> i32 {
    %c0_i32 = arith.constant 0 : i32
    %c0_i32_0 = arith.constant 0 : i32
    return %c0_i32 : i32
  }
  func.func @transform_1(%arg0: i32) -> i32 {
    %c0_i32 = arith.constant 0 : i32
    %c0_i32_0 = arith.constant 0 : i32
    return %c0_i32 : i32
  }
  func.func @transform_2(%arg0: i32) -> (i32, i32) {
    %c0_i32 = arith.constant 0 : i32
    %c0_i32_0 = arith.constant 0 : i32
    return %arg0, %c0_i32 : i32, i32
  }
  func.func @transform_3(%arg0: i32) -> (i32, i32) {
    %c0_i32 = arith.constant 0 : i32
    %c0_i32_0 = arith.constant 0 : i32
    return %arg0, %c0_i32 : i32, i32
  }
}

</mosaic_0001>

<bundles_post_ra>
// kernel: tpu_custom_call.1
= control target key start
LH: loop header
LB: loop body
LE: loop exit
PB: predicated region body
PF: predicated region fallthrough
CT: control target
= control target key end

     0   :  { %8 = vsyncpa [#allocation5], 0  ;;  %s353_s0 = inlined_call_operand.hbm [shape: f32[16], index: 0, kind: input, shape index: {}]   ;;  %s354_s1 = inlined_call_operand.vmem [shape: f32[16], index: 1, kind: input, shape index: {}]   ;;  %s355_s2 = inlined_call_operand.hbm [shape: f32[8,128], index: 2, kind: input, shape index: {}]   ;;  %s356_s3 = inlined_call_operand.hbm [shape: f32[8,128], index: 3, kind: output, shape index: {}]  }
   0x1   :  { %9 = vsyncpa [#allocation6], 0 }
   0x2   :  { %10 = vsyncpa [#allocation3], 0 }
   0x3   :  { %11 = vsyncpa [#allocation4], 0  ;;  %s26_s14 = sshll.u32 %s354_s1, 4  ;;  %s286_s15 = smov [#allocation2]   ;;  %s27_s14 = int_to_ptr.vmem [resolvable:$true] %s26_s14 }
   0x4   :  { %19 = dma.hbm_to_smem %s353_s0, 16, %s286_s15, [#allocation5]  }
   0x5   :  { %s226_s18 = scalar_lea.vmem %s27_s14, 16  ;;  %p231_p1 = scmp.lt.s32.totalorder %s27_s14, %s27_s14 }
   0x6   :  { %p227_p0 = scmp.ne.s32.totalorder %s27_s14, %s226_s18  ;;  %p232_p2 = scmp.lt.s32.totalorder %s226_s18, %s226_s18 }
   0x8   :  { %p233_p3 = por %p232_p2, %p231_p1 }
   0xa   :  { %p234_p4 = pnand %p233_p3, %p227_p0 }
   0xc   :  { %237 = shalt.err (!%p234_p4)
}
   0xd   :  { %s287_s19 = smov [#allocation7]   ;;  %s288_s20 = smov [#allocation8]  }
   0xe   :  { %29 = dma.vmem_to_smem %s27_s14, 16, %s287_s19, [#allocation6]  }
   0xf   :  { %s36_s21 = sshll.u32 %s288_s20, 4  ;;  %s37_s21 = int_to_ptr.vmem [resolvable:$true] %s36_s21 }
  0x10   :  { %s246_s22 = scalar_lea.vmem %s37_s21, 128  ;;  %p251_p6 = scmp.lt.s32.totalorder %s37_s21, %s37_s21 }
  0x11   :  { %p247_p5 = scmp.ne.s32.totalorder %s37_s21, %s246_s22  ;;  %p252_p7 = scmp.lt.s32.totalorder %s246_s22, %s246_s22 }
  0x13   :  { %p253_p8 = por %p252_p7, %p251_p6 }
  0x15   :  { %p254_p9 = pnand %p253_p8, %p247_p5 }
  0x17   :  { %257 = shalt.err (!%p254_p9)
}
  0x18   :  { %39 = dma.hbm_to_vmem [thread:$0]  %s355_s2, 128, %s37_s21, [#allocation3]  }
  0x19   :  { %278 = dma.done.wait [#allocation5], 16  }
  0x1a   :  { %279 = vsyncadd [#allocation5], 4294967280 }
  0x1b   :  { %280 = dma.done.wait [#allocation6], 16  }
  0x1c   :  { %281 = vsyncadd [#allocation6], 4294967280 }
  0x1d   :  { %282 = dma.done.wait [#allocation3], 128  }
  0x1e   :  { %283 = vsyncadd [#allocation3], 4294967168 }
  0x1f   :  { %49 = sfence }
  0x20   :  { %v50_v0 = vld [vmem:[#allocation8] sm:$0xff]  ;;  %s60_s23 = sld [smem:[#allocation2]] }
  0x21   :  { %v319_v1 = vmul.f32 15.0, %v50_v0  ;;  %s63_s24 = sld [smem:[#allocation7]] }
  0x22   :  { %s184_s25 = sld [smem:[#allocation2 + $0x1]] }
  0x23   :  { %v212_v2 = vtrunc.f32 %v319_v1  ;;  %s185_s26 = sld [smem:[#allocation7 + $0x1]] }
  0x24   :  { %s186_s27 = sld [smem:[#allocation2 + $0x2]] }
  0x25   :  { %v213_v3 = vcvt.f32.s32 %v212_v2  ;;  %s187_s28 = sld [smem:[#allocation7 + $0x2]] }
  0x26   :  { %s322_s2 = sld [smem:[#allocation2 + $0x3]]  ;;  %v61_v5 = vstv %s60_s23  ;;  %s289_s23 = smov [#allocation9]  }
  0x27   :  { %vm53_vm0 = vcmp.gt.s32.totalorder %v213_v3, 0  ;;  %s324_s29 = sld [smem:[#allocation7 + $0x3]]  ;;  %v64_v6 = vstv %s63_s24  ;;  %s173_s24 = sshll.u32 %s289_s23, 4  ;;  %s174_s24 = int_to_ptr.vmem [resolvable:$true] %s173_s24 }
  0x28   :  { %v54_v4 = vsel %vm53_vm0, %v213_v3, 0  ;;  %s326_s30 = sld [smem:[#allocation2 + $0x4]]  ;;  %v68_v8 = vstv %s184_s25  ;;  %s258_s25 = scalar_lea.vmem %s174_s24, 128 }
  0x29   :  { %vm55_vm1 = vcmp.lt.s32.totalorder %v54_v4, 14  ;;  %s191_s4 = sld [smem:[#allocation7 + $0x4]]  ;;  %v71_v9 = vstv %s185_s26  ;;  %p259_p10 = scmp.ne.s32.totalorder %s174_s24, %s258_s25 }
  0x2a   :  { %v328_v7 = vsel %vm55_vm1, %v54_v4, 14  ;;  %s192_s5 = sld [smem:[#allocation2 + $0x5]]  ;;  %v75_v10 = vstv %s186_s27  ;;  %p263_p11 = scmp.lt.s32.totalorder %s174_s24, %s174_s24 }
  0x2b   :  { %vm59_vm2 = vcmp.eq.s32.totalorder %v328_v7, 0  ;;  %vm66_vm3 = vcmp.eq.s32.totalorder %v328_v7, 1  ;;  %vm73_vm4 = vcmp.eq.s32.totalorder %v328_v7, 2  ;;  %s193_s6 = sld [smem:[#allocation7 + $0x5]]  ;;  %v78_v13 = vstv %s187_s28  ;;  %p264_p12 = scmp.lt.s32.totalorder %s258_s25, %s258_s25 }
  0x2c   :  { %v62_v11 = vsel %vm59_vm2, %v61_v5, 0.0  ;;  %v65_v12 = vsel %vm59_vm2, %v64_v6, 0.0  ;;  %vm80_vm5 = vcmp.eq.s32.totalorder %v328_v7, 3  ;;  %s194_s7 = sld [smem:[#allocation2 + $0x6]]  ;;  %v82_v16 = vstv %s322_s2 }
  0x2d   :  { %v69_v14 = vsel %vm66_vm3, %v68_v8, %v62_v11  ;;  %v72_v15 = vsel %vm66_vm3, %v71_v9, %v65_v12  ;;  %s195_s8 = sld [smem:[#allocation7 + $0x6]]  ;;  %v85_v19 = vstv %s324_s29  ;;  %vm87_vm6 = vcmp.eq.s32.totalorder %v328_v7, 4  ;;  %p265_p13 = por %p264_p12, %p263_p11 }
  0x2e   :  { %v76_v17 = vsel %vm73_vm4, %v75_v10, %v69_v14  ;;  %v79_v18 = vsel %vm73_vm4, %v78_v13, %v72_v15  ;;  %s196_s9 = sld [smem:[#allocation2 + $0x7]]  ;;  %v89_v22 = vstv %s326_s30  ;;  %vm94_vm7 = vcmp.eq.s32.totalorder %v328_v7, 5 }
  0x2f   :  { %v83_v20 = vsel %vm80_vm5, %v82_v16, %v76_v17  ;;  %v86_v21 = vsel %vm80_vm5, %v85_v19, %v79_v18  ;;  %v92_v23 = vstv %s191_s4  ;;  %s197_s10 = sld [smem:[#allocation7 + $0x7]]  ;;  %vm101_vm8 = vcmp.eq.s32.totalorder %v328_v7, 6  ;;  %p266_p0 = pnand %p265_p13, %p259_p10 }
  0x30   :  { %v90_v24 = vsel %vm87_vm6, %v89_v22, %v83_v20  ;;  %v93_v25 = vsel %vm87_vm6, %v92_v23, %v86_v21  ;;  %v96_v26 = vstv %s192_s5  ;;  %s198_s11 = sld [smem:[#allocation2 + $0x8]]  ;;  %vm108_vm9 = vcmp.eq.s32.totalorder %v328_v7, 7 }
  0x31   :  { %v97_v27 = vsel %vm94_vm7, %v96_v26, %v90_v24  ;;  %v99_v28 = vstv %s193_s6  ;;  %s199_s12 = sld [smem:[#allocation7 + $0x8]]  ;;  %vm115_vm10 = vcmp.eq.s32.totalorder %v328_v7, 8  ;;  %vm122_vm11 = vcmp.eq.s32.totalorder %v328_v7, 9 }
  0x32   :  { %v100_v29 = vsel %vm94_vm7, %v99_v28, %v93_v25  ;;  %v103_v30 = vstv %s194_s7  ;;  %s200_s13 = sld [smem:[#allocation2 + $0x9]]  ;;  %vm129_vm12 = vcmp.eq.s32.totalorder %v328_v7, 10  ;;  %vm136_vm13 = vcmp.eq.s32.totalorder %v328_v7, 11 }
  0x33   :  { %v104_v31 = vsel %vm101_vm8, %v103_v30, %v97_v27  ;;  %v106_v32 = vstv %s195_s8  ;;  %s201_s14 = sld [smem:[#allocation7 + $0x9]]  ;;  %v57_v51 = vcvt.s32.f32 %v328_v7  ;;  %vm143_vm14 = vcmp.eq.s32.totalorder %v328_v7, 12 }
  0x34   :  { %v107_v33 = vsel %vm101_vm8, %v106_v32, %v100_v29  ;;  %v110_v34 = vstv %s196_s9  ;;  %s202_s15 = sld [smem:[#allocation2 + $0xa]]  ;;  %vm150_vm15 = vcmp.eq.s32.totalorder %v328_v7, 13  ;;  %vm157_vm0 = vcmp.eq.s32.totalorder %v328_v7, 14 }
  0x35   :  { %v111_v35 = vsel %vm108_vm9, %v110_v34, %v104_v31  ;;  %v113_v36 = vstv %s197_s10  ;;  %s203_s16 = sld [smem:[#allocation7 + $0xa]]  ;;  %v58_v60 = vsub.f32 %v319_v1, %v57_v51 }
  0x36   :  { %v114_v37 = vsel %vm108_vm9, %v113_v36, %v107_v33  ;;  %v117_v38 = vstv %s198_s11  ;;  %s204_s17 = sld [smem:[#allocation2 + $0xb]] }
  0x37   :  { %v118_v39 = vsel %vm115_vm10, %v117_v38, %v111_v35  ;;  %v120_v40 = vstv %s199_s12  ;;  %s205_s18 = sld [smem:[#allocation7 + $0xb]] }
  0x38   :  { %v121_v41 = vsel %vm115_vm10, %v120_v40, %v114_v37  ;;  %v124_v42 = vstv %s200_s13  ;;  %s206_s19 = sld [smem:[#allocation2 + $0xc]] }
  0x39   :  { %v125_v43 = vsel %vm122_vm11, %v124_v42, %v118_v39  ;;  %v127_v44 = vstv %s201_s14  ;;  %s207_s20 = sld [smem:[#allocation7 + $0xc]] }
  0x3a   :  { %v128_v45 = vsel %vm122_vm11, %v127_v44, %v121_v41  ;;  %v131_v46 = vstv %s202_s15  ;;  %s208_s21 = sld [smem:[#allocation2 + $0xd]] }
  0x3b   :  { %v132_v47 = vsel %vm129_vm12, %v131_v46, %v125_v43  ;;  %v134_v48 = vstv %s203_s16  ;;  %s209_s22 = sld [smem:[#allocation7 + $0xd]] }
  0x3c   :  { %v135_v49 = vsel %vm129_vm12, %v134_v48, %v128_v45  ;;  %v138_v50 = vstv %s204_s17  ;;  %s210_s0 = sld [smem:[#allocation2 + $0xe]] }
  0x3d   :  { %v139_v52 = vsel %vm136_vm13, %v138_v50, %v132_v47  ;;  %v141_v53 = vstv %s205_s18  ;;  %s211_s1 = sld [smem:[#allocation7 + $0xe]] }
  0x3e   :  { %v142_v54 = vsel %vm136_vm13, %v141_v53, %v135_v49  ;;  %v145_v55 = vstv %s206_s19 }
  0x3f   :  { %v146_v56 = vsel %vm143_vm14, %v145_v55, %v139_v52  ;;  %v148_v57 = vstv %s207_s20 }
  0x40   :  { %v149_v58 = vsel %vm143_vm14, %v148_v57, %v142_v54  ;;  %v152_v59 = vstv %s208_s21 }
  0x41   :  { %v153_v61 = vsel %vm150_vm15, %v152_v59, %v146_v56  ;;  %v155_v62 = vstv %s209_s22 }
  0x42   :  { %v156_v63 = vsel %vm150_vm15, %v155_v62, %v149_v58  ;;  %v159_v0 = vstv %s210_s0 }
  0x43   :  { %v162_v2 = vstv %s211_s1  ;;  %v160_v3 = vsel %vm157_vm0, %v159_v0, %v153_v61 }
  0x44   :  { %v163_v4 = vsel %vm157_vm0, %v162_v2, %v156_v63 }
  0x45   :  { %v164_v5 = vmul.f32 %v163_v4, %v58_v60 }
  0x47   :  { %v165_v6 = vadd.f32 %v164_v5, %v160_v3 }
  0x49   :  { %166 = vst [vmem:[#allocation9] sm:$0xff] %v165_v6 }
  0x4a   :  { %269 = shalt.err (!%p266_p0)
}
  0x4b   :  { %176 = dma.vmem_to_hbm [thread:$0]  %s174_s24, 128, %s356_s3, [#allocation4]  }
  0x4c   :  { %284 = dma.done.wait [#allocation4], 128  }
  0x4d   :  { %285 = vsyncadd [#allocation4], 4294967168 }
  0x4e   :  { %180 = vsyncpa [#allocation3], 1 }
  0x4f   :  { %181 = vsyncpa [#allocation4], 1 }
  0x50   :  { %182 = vsyncpa [#allocation5], 1 }
  0x51   :  { %183 = vsyncpa [#allocation6], 1 }

</bundles_post_ra>
